<compile_context>
chip_gen: v7x
topology: tpu7x:2x2x1
jax: 0.10.0
libtpu: 0.0.40
codegen_flags: <defaults>
</compile_context>

<pallas_src>
import functools

import jax
import jax.numpy as jnp
from jax.experimental import pallas as pl
from jax.experimental.pallas import tpu as pltpu

_LANE = 128
_SUBLANE = 8


def _ru(n, m):
    return ((n + m - 1) // m) * m


def _pad2d(a, rows, cols):
    r, c = a.shape
    return jnp.pad(a, ((0, rows - r), (0, cols - c)))


def _fused_mlp_kernel(*refs, num_hidden, out_f_pad):
    """Whole MLP for one batch tile.

    refs = (x,
            w0, b0, ..., w_{H-1}, b_{H-1},   # hidden layers (ReLU)
            w_final, b_final,                # final layer, [main_pad | pass_pad]
            o_main, o_pass)
    """
    x_ref = refs[0]
    hidden_refs = refs[1:1 + 2 * num_hidden]
    w_fin_ref = refs[1 + 2 * num_hidden]
    b_fin_ref = refs[2 + 2 * num_hidden]
    o_main_ref = refs[3 + 2 * num_hidden]
    o_pass_ref = refs[4 + 2 * num_hidden]

    h = x_ref[...].astype(jnp.float32)
    for i in range(num_hidden):  # static unroll; activations stay on-chip
        w = hidden_refs[2 * i][...]
        b = hidden_refs[2 * i + 1][...]
        h = jnp.dot(h, w, preferred_element_type=jnp.float32) + b
        h = jnp.maximum(h, 0.0)

    # Final layer: one MXU matmul, then two lane-aligned (128-multiple) slices.
    y = jnp.dot(h, w_fin_ref[...], preferred_element_type=jnp.float32)
    y = y + b_fin_ref[...]
    o_main_ref[...] = y[:, :out_f_pad].astype(o_main_ref.dtype)            # linear
    o_pass_ref[...] = jnp.maximum(y[:, out_f_pad:], 0.0).astype(o_pass_ref.dtype)  # relu


def init_mlp_params(key, in_f, out_f, h=(), passf=0, dtype=jnp.float32):
    """nn.Linear-style init (U(-1/sqrt(fan_in), +1/sqrt(fan_in))).

    Weights are stored pre-transposed [in, out] and zero-padded so every
    feature dim is a multiple of 128 (lane-dense). Unpadded copies are kept
    under "raw" for the reference check.
    """
    h = list(h)
    in_f_pad = _ru(in_f, _LANE)

    raw = []
    hidden = []
    prev, prev_pad = in_f, in_f_pad
    for of in h:
        of_pad = _ru(of, _LANE)
        key, kw, kb = jax.random.split(key, 3)
        bound = 1.0 / (prev ** 0.5)
        w = jax.random.uniform(kw, (prev, of), dtype, minval=-bound, maxval=bound)
        b = jax.random.uniform(kb, (1, of), dtype, minval=-bound, maxval=bound)
        raw.append((w, b))
        hidden.append((_pad2d(w, prev_pad, of_pad), _pad2d(b, 1, of_pad)))
        prev, prev_pad = of, of_pad

    # Final layer: out_f + passf columns; pad each half to a lane multiple and
    # concatenate so the split happens at a 128-aligned lane boundary.
    key, kw, kb = jax.random.split(key, 3)
    bound = 1.0 / (prev ** 0.5)
    of = out_f + passf
    w = jax.random.uniform(kw, (prev, of), dtype, minval=-bound, maxval=bound)
    b = jax.random.uniform(kb, (1, of), dtype, minval=-bound, maxval=bound)
    raw.append((w, b))

    out_f_pad = _ru(max(out_f, 1), _LANE)
    passf_pad = _ru(max(passf, 1), _LANE)
    w_final = jnp.concatenate(
        [_pad2d(w[:, :out_f], prev_pad, out_f_pad),
         _pad2d(w[:, out_f:], prev_pad, passf_pad)], axis=1)
    b_final = jnp.concatenate(
        [_pad2d(b[:, :out_f], 1, out_f_pad),
         _pad2d(b[:, out_f:], 1, passf_pad)], axis=1)

    return {
        "hidden": hidden,
        "final": (w_final, b_final),
        "raw": raw,
        "in_f": in_f, "in_f_pad": in_f_pad,
        "out_f": out_f, "out_f_pad": out_f_pad,
        "passf": passf, "passf_pad": passf_pad,
        "dtype": dtype,
    }


def mlp_forward(x, p):
    """Matches MLP.forward: flatten, hidden ReLU layers, final (linear, relu) split."""
    dtype = p["dtype"]
    B = x.shape[0]
    xf = x.reshape(B, -1).astype(dtype)  # == x.view(x.size(0), -1)
    in_f, in_f_pad = p["in_f"], p["in_f_pad"]
    assert xf.shape[1] == in_f

    # Batch tiling: sublane-aligned tile, 1-D grid over batch tiles.
    tm = min(_ru(B, _SUBLANE), 256)
    Mp = _ru(B, tm)
    x_pad = _pad2d(xf, Mp, in_f_pad)

    num_hidden = len(p["hidden"])
    flat = []
    for (w, b) in p["hidden"]:
        flat += [w, b]
    flat += list(p["final"])

    out_f_pad, passf_pad = p["out_f_pad"], p["passf_pad"]
    grid = (Mp // tm,)

    in_specs = [pl.BlockSpec((tm, in_f_pad), lambda i: (i, 0))]
    for a in flat:  # weights / biases: full-array blocks, resident across grid
        in_specs.append(pl.BlockSpec(a.shape, lambda i: (0, 0)))
    out_specs = (
        pl.BlockSpec((tm, out_f_pad), lambda i: (i, 0)),
        pl.BlockSpec((tm, passf_pad), lambda i: (i, 0)),
    )
    out_shape = (
        jax.ShapeDtypeStruct((Mp, out_f_pad), dtype),
        jax.ShapeDtypeStruct((Mp, passf_pad), dtype),
    )

    # Cost hint so XLA overlaps surrounding reshape/pad/slice with the kernel.
    itemsize = jnp.dtype(dtype).itemsize
    flops = 0
    prev = in_f_pad
    for (w, _) in p["hidden"]:
        flops += 2 * Mp * prev * w.shape[1]
        prev = w.shape[1]
    flops += 2 * Mp * prev * (out_f_pad + passf_pad)
    bytes_accessed = (x_pad.size + sum(a.size for a in flat)
                      + Mp * (out_f_pad + passf_pad)) * itemsize

    kernel = functools.partial(
        _fused_mlp_kernel, num_hidden=num_hidden, out_f_pad=out_f_pad)
    y_main, y_pass = pl.pallas_call(
        kernel,
        out_shape=out_shape,
        grid=grid,
        in_specs=in_specs,
        out_specs=out_specs,
        compiler_params=pltpu.CompilerParams(
            dimension_semantics=("parallel",)),  # megacore / v7x 2-TC sharding
        cost_estimate=pl.CostEstimate(
            flops=flops, transcendentals=0, bytes_accessed=bytes_accessed),
    )(x_pad, *flat)

    return y_main[:B, :p["out_f"]], y_pass[:B, :p["passf"]]


if __name__ == "__main__":
    # Small shapes consistent with the module's forward (NCHW input, flattened).
    N, C, H, W = 2, 4, 16, 16
    in_f = C * H * W                    # 1024 after flatten
    hidden = [32]
    out_f = 8
    passf = 4

    key = jax.random.PRNGKey(0)
    kx, kp = jax.random.split(key)
    x = jax.random.normal(kx, (N, C, H, W), dtype=jnp.float32)
    params = init_mlp_params(kp, in_f, out_f, hidden, passf)

    fwd = jax.jit(lambda xx: mlp_forward(xx, params))
    main_out, pass_out = fwd(x)
    main_out = jax.block_until_ready(main_out)
    pass_out = jax.block_until_ready(pass_out)

    # Pure-JAX reference check (unpadded weights).
    raw = params["raw"]
    hbuf = x.reshape(N, -1)
    for (w, b) in raw[:-1]:
        hbuf = jnp.maximum(hbuf @ w + b, 0.0)
    yref = hbuf @ raw[-1][0] + raw[-1][1]
    ref_main = yref[:, :out_f]
    ref_pass = jnp.maximum(yref[:, out_f:], 0.0)

    assert main_out.shape == (N, out_f) and pass_out.shape == (N, passf)
    assert jnp.allclose(main_out, ref_main, atol=1e-4, rtol=1e-4)
    assert jnp.allclose(pass_out, ref_pass, atol=1e-4, rtol=1e-4)

    print("KERNEL_OK")
</pallas_src>

<mosaic_0001>
module attributes {stable_mosaic.version = 11 : i64} {
  func.func @_fused_mlp_kernel(%arg0: i32, %arg1: memref<8x1024xf32, #tpu.memory_space<vmem>>, %arg2: memref<1024x128xf32, #tpu.memory_space<vmem>>, %arg3: memref<1x128xf32, #tpu.memory_space<vmem>>, %arg4: memref<128x256xf32, #tpu.memory_space<vmem>>, %arg5: memref<1x256xf32, #tpu.memory_space<vmem>>, %arg6: memref<8x128xf32, #tpu.memory_space<vmem>>, %arg7: memref<8x128xf32, #tpu.memory_space<vmem>>) attributes {dimension_semantics = [#tpu.dimension_semantics<parallel>], iteration_bounds = array<i64: 1>, scalar_prefetch = 0 : i64, scratch_operands = 0 : i64, tpu.core_type = #tpu.core_type<tc>, window_params = [{transform_indices = @transform_0, window_bounds = array<i64: 8, 1024>}, {pipeline_mode = #tpu.pipeline_mode<synchronous>, transform_indices = @transform_1, window_bounds = array<i64: 1024, 128>}, {pipeline_mode = #tpu.pipeline_mode<synchronous>, transform_indices = @transform_2, window_bounds = array<i64: 1, 128>}, {pipeline_mode = #tpu.pipeline_mode<synchronous>, transform_indices = @transform_3, window_bounds = array<i64: 128, 256>}, {pipeline_mode = #tpu.pipeline_mode<synchronous>, transform_indices = @transform_4, window_bounds = array<i64: 1, 256>}, {transform_indices = @transform_5, window_bounds = array<i64: 8, 128>}, {transform_indices = @transform_6, window_bounds = array<i64: 8, 128>}]} {
    %c0 = arith.constant 0 : index
    %c0_0 = arith.constant 0 : index
    %0 = vector.load %arg1[%c0, %c0_0] : memref<8x1024xf32, #tpu.memory_space<vmem>>, vector<8x1024xf32>
    %c0_1 = arith.constant 0 : index
    %c0_2 = arith.constant 0 : index
    %1 = vector.load %arg2[%c0_1, %c0_2] : memref<1024x128xf32, #tpu.memory_space<vmem>>, vector<1024x128xf32>
    %c0_3 = arith.constant 0 : index
    %c0_4 = arith.constant 0 : index
    %2 = vector.load %arg3[%c0_3, %c0_4] : memref<1x128xf32, #tpu.memory_space<vmem>>, vector<1x128xf32>
    %cst = arith.constant dense<0.000000e+00> : vector<8x128xf32>
    %3 = tpu.matmul %0, %1, %cst {dimension_numbers = #tpu.dot_dimension_numbers<[1], [0], [0], [1], [0, 0, 1, 1], [], []>} : vector<8x1024xf32>, vector<1024x128xf32>, vector<8x128xf32> -> vector<8x128xf32>
    %4 = vector.broadcast %2 : vector<1x128xf32> to vector<8x128xf32>
    %5 = arith.addf %3, %4 : vector<8x128xf32>
    %cst_5 = arith.constant 0.000000e+00 : f32
    %6 = vector.broadcast %cst_5 : f32 to vector<8x128xf32>
    %7 = arith.maximumf %5, %6 : vector<8x128xf32>
    %c0_6 = arith.constant 0 : index
    %c0_7 = arith.constant 0 : index
    %8 = vector.load %arg4[%c0_6, %c0_7] : memref<128x256xf32, #tpu.memory_space<vmem>>, vector<128x256xf32>
    %cst_8 = arith.constant dense<0.000000e+00> : vector<8x256xf32>
    %9 = tpu.matmul %7, %8, %cst_8 {dimension_numbers = #tpu.dot_dimension_numbers<[1], [0], [0], [1], [0, 0, 1, 1], [], []>} : vector<8x128xf32>, vector<128x256xf32>, vector<8x256xf32> -> vector<8x256xf32>
    %c0_9 = arith.constant 0 : index
    %c0_10 = arith.constant 0 : index
    %10 = vector.load %arg5[%c0_9, %c0_10] : memref<1x256xf32, #tpu.memory_space<vmem>>, vector<1x256xf32>
    %11 = vector.broadcast %10 : vector<1x256xf32> to vector<8x256xf32>
    %12 = arith.addf %9, %11 : vector<8x256xf32>
    %13 = vector.extract_strided_slice %12 {offsets = [0, 0], sizes = [8, 128], strides = [1, 1]} : vector<8x256xf32> to vector<8x128xf32>
    %c0_11 = arith.constant 0 : index
    %c0_12 = arith.constant 0 : index
    %14 = vector.load %arg6[%c0_11, %c0_12] : memref<8x128xf32, #tpu.memory_space<vmem>>, vector<8x128xf32>
    tpu.vector_store %arg6[%c0_11, %c0_12], %13 {strides = array<i32>} : memref<8x128xf32, #tpu.memory_space<vmem>>, vector<8x128xf32>,
    %15 = vector.extract_strided_slice %12 {offsets = [0, 128], sizes = [8, 128], strides = [1, 1]} : vector<8x256xf32> to vector<8x128xf32>
    %cst_13 = arith.constant 0.000000e+00 : f32
    %16 = vector.broadcast %cst_13 : f32 to vector<8x128xf32>
    %17 = arith.maximumf %15, %16 : vector<8x128xf32>
    %c0_14 = arith.constant 0 : index
    %c0_15 = arith.constant 0 : index
    %18 = vector.load %arg7[%c0_14, %c0_15] : memref<8x128xf32, #tpu.memory_space<vmem>>, vector<8x128xf32>
    tpu.vector_store %arg7[%c0_14, %c0_15], %17 {strides = array<i32>} : memref<8x128xf32, #tpu.memory_space<vmem>>, vector<8x128xf32>,
    return
  }
  func.func @transform_0(%arg0: i32) -> (i32, i32) {
    %c0_i32 = arith.constant 0 : i32
    %c0_i32_0 = arith.constant 0 : i32
    return %arg0, %c0_i32 : i32, i32
  }
  func.func @transform_1(%arg0: i32) -> (i32, i32) {
    %c0_i32 = arith.constant 0 : i32
    %c0_i32_0 = arith.constant 0 : i32
    %c0_i32_1 = arith.constant 0 : i32
    return %c0_i32, %c0_i32_0 : i32, i32
  }
  func.func @transform_2(%arg0: i32) -> (i32, i32) {
    %c0_i32 = arith.constant 0 : i32
    %c0_i32_0 = arith.constant 0 : i32
    %c0_i32_1 = arith.constant 0 : i32
    return %c0_i32, %c0_i32_0 : i32, i32
  }
  func.func @transform_3(%arg0: i32) -> (i32, i32) {
    %c0_i32 = arith.constant 0 : i32
    %c0_i32_0 = arith.constant 0 : i32
    %c0_i32_1 = arith.constant 0 : i32
    return %c0_i32, %c0_i32_0 : i32, i32
  }
  func.func @transform_4(%arg0: i32) -> (i32, i32) {
    %c0_i32 = arith.constant 0 : i32
    %c0_i32_0 = arith.constant 0 : i32
    %c0_i32_1 = arith.constant 0 : i32
    return %c0_i32, %c0_i32_0 : i32, i32
  }
  func.func @transform_5(%arg0: i32) -> (i32, i32) {
    %c0_i32 = arith.constant 0 : i32
    %c0_i32_0 = arith.constant 0 : i32
    return %arg0, %c0_i32 : i32, i32
  }
  func.func @transform_6(%arg0: i32) -> (i32, i32) {
    %c0_i32 = arith.constant 0 : i32
    %c0_i32_0 = arith.constant 0 : i32
    return %arg0, %c0_i32 : i32, i32
  }
}

</mosaic_0001>

<bundles_post_ra>
// kernel: _lambda_.1
= control target key start
LH: loop header
LB: loop body
LE: loop exit
PB: predicated region body
PF: predicated region fallthrough
CT: control target
= control target key end

     0   :  { %12 = vsyncpa [#allocation3], 0  ;;  %s1060_s0 = inlined_call_operand.vmem [shape: f32[8,1024], index: 0, kind: input, shape index: {}]   ;;  %s1061_s1 = inlined_call_operand.hbm [shape: f32[1024,128], index: 1, kind: input, shape index: {}]   ;;  %s1062_s2 = inlined_call_operand.vmem [shape: f32[1,128], index: 2, kind: input, shape index: {}]   ;;  %s1063_s3 = inlined_call_operand.hbm [shape: f32[128,256], index: 3, kind: input, shape index: {}]   ;;  %s1064_s4 = inlined_call_operand.vmem [shape: f32[1,256], index: 4, kind: input, shape index: {}]   ;;  %s1065_s5 = inlined_call_operand.vmem [shape: f32[8,128], index: 5, kind: output, shape index: {0}]   ;;  %s1066_s6 = inlined_call_operand.vmem [shape: f32[8,128], index: 6, kind: output, shape index: {1}]  }
   0x1   :  { %13 = vsyncpa [#allocation5], 0  ;;  %s958_s21 = smov [#allocation2]   ;;  %s910_s25 = scalar_lea.hbm %s1061_s1, 16384 }
   0x2   :  { %s21_s22 = sshll.u32 %s958_s21, 4  ;;  %p911_p0 = scmp.ne.s32.totalorder %s1061_s1, %s910_s25  ;;  %s22_s22 = int_to_ptr.vmem [resolvable:$true] %s21_s22 }
   0x3   :  { %p914_p1 = scmp.lt.u32.totalorder %s910_s25, %s1061_s1 }
   0x5   :  { %p916_p2 = pnand %p914_p1, %p911_p0 }
   0x7   :  { %919 = shalt.err (!%p916_p2)
}
   0x8   :  { %s920_s30 = scalar_lea.vmem %s22_s22, 16384  ;;  %p925_p4 = scmp.lt.s32.totalorder %s22_s22, %s22_s22 }
   0x9   :  { %p921_p3 = scmp.ne.s32.totalorder %s22_s22, %s920_s30  ;;  %p926_p5 = scmp.lt.s32.totalorder %s920_s30, %s920_s30 }
   0xb   :  { %p927_p6 = por %p926_p5, %p925_p4 }
   0xd   :  { %p928_p7 = pnand %p927_p6, %p921_p3 }
   0xf   :  { %931 = shalt.err (!%p928_p7)
}
  0x10   :  { %s959_s7 = smov 128   ;;  %s960_s8 = smov 8  }
  0x11   :  { %27 = dma.hbm_to_vmem [thread:$0]  %s1061_s1, 16384, %s22_s22, [#allocation3], %s959_s7, %s959_s7, %s960_s8  }
  0x12   :  { %s961_s11 = smov [#allocation4]   ;;  %s932_s15 = scalar_lea.hbm %s1063_s3, 4096 }
  0x13   :  { %s35_s12 = sshll.u32 %s961_s11, 4  ;;  %p933_p8 = scmp.ne.s32.totalorder %s1063_s3, %s932_s15  ;;  %s36_s12 = int_to_ptr.vmem [resolvable:$true] %s35_s12 }
  0x14   :  { %p936_p9 = scmp.lt.u32.totalorder %s932_s15, %s1063_s3 }
  0x16   :  { %p938_p10 = pnand %p936_p9, %p933_p8 }
  0x18   :  { %941 = shalt.err (!%p938_p10)
}
  0x19   :  { %s942_s20 = scalar_lea.vmem %s36_s12, 4096  ;;  %p947_p12 = scmp.lt.s32.totalorder %s36_s12, %s36_s12 }
  0x1a   :  { %p943_p11 = scmp.ne.s32.totalorder %s36_s12, %s942_s20  ;;  %p948_p13 = scmp.lt.s32.totalorder %s942_s20, %s942_s20 }
  0x1c   :  { %p949_p0 = por %p948_p13, %p947_p12 }
  0x1e   :  { %p950_p1 = pnand %p949_p0, %p943_p11 }
  0x20   :  { %953 = shalt.err (!%p950_p1)
}
  0x21   :  { %s962_s1 = smov 256   ;;  %s963_s21 = smov 16  }
  0x22   :  { %41 = dma.hbm_to_vmem [thread:$0]  %s1063_s3, 4096, %s36_s12, [#allocation5], %s962_s1, %s962_s1, %s963_s21  }
  0x23   :  { %954 = dma.done.wait [#allocation3], 16384  }
  0x24   :  { %955 = vsyncadd [#allocation3], 4294950912 }
  0x25   :  { %956 = dma.done.wait [#allocation5], 4096  }
  0x26   :  { %957 = vsyncadd [#allocation5], 4294963200  ;;  %v74_v0 = vld [vmem:[#allocation2 + $0x80] sm:$0xff]  ;;  %v75_v1 = vld [vmem:[#allocation2 + $0x88] sm:$0xff] }
  0x27   :  { %v58_v2 = vld [vmem:[#allocation2] sm:$0xff]  ;;  %v743_v3 = vpack.c.bf16 %v75_v1, %v74_v0  ;;  %v59_v4 = vld [vmem:[#allocation2 + $0x8] sm:$0xff]  ;;  %v76_v11 = vld [vmem:[#allocation2 + $0x90] sm:$0xff] }
  0x28   :  { %v106_v5 = vld [vmem:[#allocation2 + $0x180] sm:$0xff]  ;;  %v107_v6 = vld [vmem:[#allocation2 + $0x188] sm:$0xff]  ;;  %v745_v7 = vpack.c.bf16 %v59_v4, %v58_v2  ;;  %v77_v13 = vld [vmem:[#allocation2 + $0x98] sm:$0xff] }
  0x29   :  { %v775_v8 = vpack.c.bf16 %v107_v6, %v106_v5  ;;  %v90_v9 = vld [vmem:[#allocation2 + $0x100] sm:$0xff]  ;;  %v91_v10 = vld [vmem:[#allocation2 + $0x108] sm:$0xff]  ;;  %744 = vmatprep.subr.bf16.mxu0 %v743_v3  ;;  %v60_v14 = vld [vmem:[#allocation2 + $0x10] sm:$0xff]  ;;  %v747_v16 = vpack.c.bf16 %v77_v13, %v76_v11 }
  0x2a   :  { %v777_v12 = vpack.c.bf16 %v91_v10, %v90_v9  ;;  %v61_v15 = vld [vmem:[#allocation2 + $0x18] sm:$0xff]  ;;  %746 = vmatpush3.bf16.msra.mxu0 %v745_v7  ;;  %v108_v18 = vld [vmem:[#allocation2 + $0x190] sm:$0xff]  ;;  %v78_v23 = vld [vmem:[#allocation2 + $0xa0] sm:$0xff] }
  0x2b   :  { %776 = vmatprep.subr.bf16.mxu1 %v775_v8  ;;  %v749_v17 = vpack.c.bf16 %v61_v15, %v60_v14  ;;  %v109_v19 = vld [vmem:[#allocation2 + $0x198] sm:$0xff]  ;;  %v92_v20 = vld [vmem:[#allocation2 + $0x110] sm:$0xff]  ;;  %v79_v24 = vld [vmem:[#allocation2 + $0xa8] sm:$0xff]  ;;  %748 = vmatprep.subr.bf16.mxu0 %v747_v16 }
  0x2c   :  { %778 = vmatpush3.bf16.msra.mxu1 %v777_v12  ;;  %v779_v21 = vpack.c.bf16 %v109_v19, %v108_v18  ;;  %v93_v22 = vld [vmem:[#allocation2 + $0x118] sm:$0xff]  ;;  %v751_v26 = vpack.c.bf16 %v79_v24, %v78_v23  ;;  %v62_v27 = vld [vmem:[#allocation2 + $0x20] sm:$0xff]  ;;  %v63_v28 = vld [vmem:[#allocation2 + $0x28] sm:$0xff] }
  0x2d   :  { %v781_v25 = vpack.c.bf16 %v93_v22, %v92_v20  ;;  %v110_v29 = vld [vmem:[#allocation2 + $0x1a0] sm:$0xff]  ;;  %v111_v30 = vld [vmem:[#allocation2 + $0x1a8] sm:$0xff]  ;;  %v753_v33 = vpack.c.bf16 %v63_v28, %v62_v27  ;;  %v80_v35 = vld [vmem:[#allocation2 + $0xb0] sm:$0xff] }
  0x2e   :  { %780 = vmatprep.subr.bf16.mxu1 %v779_v21  ;;  %v94_v31 = vld [vmem:[#allocation2 + $0x120] sm:$0xff]  ;;  %v95_v32 = vld [vmem:[#allocation2 + $0x128] sm:$0xff]  ;;  %750 = vmatpush3.bf16.msra.mxu0 %v749_v17  ;;  %v783_v34 = vpack.c.bf16 %v111_v30, %v110_v29  ;;  %v81_v36 = vld [vmem:[#allocation2 + $0xb8] sm:$0xff] }
  0x2f   :  { %v64_v37 = vld [vmem:[#allocation2 + $0x30] sm:$0xff]  ;;  %752 = vmatprep.subr.bf16.mxu0 %v751_v26  ;;  %v785_v38 = vpack.c.bf16 %v95_v32, %v94_v31  ;;  %v755_v39 = vpack.c.bf16 %v81_v36, %v80_v35  ;;  %v65_v40 = vld [vmem:[#allocation2 + $0x38] sm:$0xff]  ;;  %v82_v46 = vld [vmem:[#allocation2 + $0xc0] sm:$0xff] }
  0x30   :  { %782 = vmatpush3.bf16.msra.mxu1 %v781_v25  ;;  %v112_v41 = vld [vmem:[#allocation2 + $0x1b0] sm:$0xff]  ;;  %v113_v42 = vld [vmem:[#allocation2 + $0x1b8] sm:$0xff]  ;;  %v83_v47 = vld [vmem:[#allocation2 + $0xc8] sm:$0xff]  ;;  %v757_v48 = vpack.c.bf16 %v65_v40, %v64_v37 }
  0x31   :  { %784 = vmatprep.subr.bf16.mxu1 %v783_v34  ;;  %v787_v43 = vpack.c.bf16 %v113_v42, %v112_v41  ;;  %v96_v44 = vld [vmem:[#allocation2 + $0x130] sm:$0xff]  ;;  %v97_v45 = vld [vmem:[#allocation2 + $0x138] sm:$0xff]  ;;  %v114_v49 = vld [vmem:[#allocation2 + $0x1c0] sm:$0xff]  ;;  %v759_v52 = vpack.c.bf16 %v83_v47, %v82_v46 }
  0x32   :  { %754 = vmatpush3.bf16.msra.mxu0 %v753_v33  ;;  %v115_v50 = vld [vmem:[#allocation2 + $0x1c8] sm:$0xff]  ;;  %v789_v51 = vpack.c.bf16 %v97_v45, %v96_v44  ;;  %v66_v53 = vld [vmem:[#allocation2 + $0x40] sm:$0xff]  ;;  %v84_v58 = vld [vmem:[#allocation2 + $0xd0] sm:$0xff] }
  0x33   :  { %756 = vmatprep.subr.bf16.mxu0 %v755_v39  ;;  %v67_v54 = vld [vmem:[#allocation2 + $0x48] sm:$0xff]  ;;  %v98_v55 = vld [vmem:[#allocation2 + $0x140] sm:$0xff]  ;;  %v791_v56 = vpack.c.bf16 %v115_v50, %v114_v49  ;;  %v85_v59 = vld [vmem:[#allocation2 + $0xd8] sm:$0xff] }
  0x34   :  { %786 = vmatpush3.bf16.msra.mxu1 %v785_v38  ;;  %v99_v57 = vld [vmem:[#allocation2 + $0x148] sm:$0xff]  ;;  %v116_v60 = vld [vmem:[#allocation2 + $0x1d0] sm:$0xff]  ;;  %v117_v61 = vld [vmem:[#allocation2 + $0x1d8] sm:$0xff]  ;;  %v761_v62 = vpack.c.bf16 %v67_v54, %v66_v53  ;;  %v763_v0 = vpack.c.bf16 %v85_v59, %v84_v58 }
  0x35   :  { %788 = vmatprep.subr.bf16.mxu1 %v787_v43  ;;  %v793_v63 = vpack.c.bf16 %v99_v57, %v98_v55  ;;  %v68_v1 = vld [vmem:[#allocation2 + $0x50] sm:$0xff]  ;;  %v69_v2 = vld [vmem:[#allocation2 + $0x58] sm:$0xff]  ;;  %v795_v4 = vpack.c.bf16 %v117_v61, %v116_v60  ;;  %v86_v6 = vld [vmem:[#allocation2 + $0xe0] sm:$0xff] }
  0x36   :  { %758 = vmatpush3.bf16.msra.mxu0 %v757_v48  ;;  %v100_v3 = vld [vmem:[#allocation2 + $0x150] sm:$0xff]  ;;  %v101_v5 = vld [vmem:[#allocation2 + $0x158] sm:$0xff]  ;;  %v87_v7 = vld [vmem:[#allocation2 + $0xe8] sm:$0xff]  ;;  %v765_v10 = vpack.c.bf16 %v69_v2, %v68_v1 }
  0x37   :  { %760 = vmatprep.subr.bf16.mxu0 %v759_v52  ;;  %v118_v8 = vld [vmem:[#allocation2 + $0x1e0] sm:$0xff]  ;;  %v119_v9 = vld [vmem:[#allocation2 + $0x1e8] sm:$0xff]  ;;  %v797_v13 = vpack.c.bf16 %v101_v5, %v100_v3  ;;  %v767_v14 = vpack.c.bf16 %v87_v7, %v86_v6  ;;  %v88_v19 = vld [vmem:[#allocation2 + $0xf0] sm:$0xff] }
  0x38   :  { %790 = vmatpush3.bf16.msra.mxu1 %v789_v51  ;;  %v70_v11 = vld [vmem:[#allocation2 + $0x60] sm:$0xff]  ;;  %v71_v12 = vld [vmem:[#allocation2 + $0x68] sm:$0xff]  ;;  %v799_v18 = vpack.c.bf16 %v119_v9, %v118_v8  ;;  %v89_v20 = vld [vmem:[#allocation2 + $0xf8] sm:$0xff] }
  0x39   :  { %792 = vmatprep.subr.bf16.mxu1 %v791_v56  ;;  %v102_v15 = vld [vmem:[#allocation2 + $0x160] sm:$0xff]  ;;  %v103_v16 = vld [vmem:[#allocation2 + $0x168] sm:$0xff]  ;;  %v53_v21 = vld [vmem:[%s1060_s0 + $0x18] sm:$0xff]  ;;  %v769_v24 = vpack.c.bf16 %v71_v12, %v70_v11  ;;  %v771_v26 = vpack.c.bf16 %v89_v20, %v88_v19 }
  0x3a   :  { %762 = vmatpush3.bf16.msra.mxu0 %v761_v62  ;;  %v51_v17 = vld [vmem:[%s1060_s0 + $0x8] sm:$0xff]  ;;  %v120_v22 = vld [vmem:[#allocation2 + $0x1f0] sm:$0xff]  ;;  %v121_v23 = vld [vmem:[#allocation2 + $0x1f8] sm:$0xff]  ;;  %327 = vmatprep.mubr.f32.mxu1 %v53_v21  ;;  %v801_v25 = vpack.c.bf16 %v103_v16, %v102_v15 }
  0x3b   :  { %764 = vmatprep.subr.bf16.mxu0 %v763_v0  ;;  %257 = vmatprep.mubr.f32.mxu0 %v51_v17  ;;  %v72_v27 = vld [vmem:[#allocation2 + $0x70] sm:$0xff]  ;;  %v73_v28 = vld [vmem:[#allocation2 + $0x78] sm:$0xff]  ;;  %v803_v30 = vpack.c.bf16 %v121_v23, %v120_v22  ;;  %v138_v32 = vld [vmem:[#allocation2 + $0x280] sm:$0xff] }
  0x3c   :  { %794 = vmatpush3.bf16.msra.mxu1 %v793_v63  ;;  %v104_v29 = vld [vmem:[#allocation2 + $0x170] sm:$0xff]  ;;  %v105_v31 = vld [vmem:[#allocation2 + $0x178] sm:$0xff]  ;;  %v139_v33 = vld [vmem:[#allocation2 + $0x288] sm:$0xff]  ;;  %v773_v36 = vpack.c.bf16 %v73_v28, %v72_v27 }
  0x3d   :  { %796 = vmatprep.subr.bf16.mxu1 %v795_v4  ;;  %v170_v34 = vld [vmem:[#allocation2 + $0x380] sm:$0xff]  ;;  %v171_v35 = vld [vmem:[#allocation2 + $0x388] sm:$0xff]  ;;  %v805_v37 = vpack.c.bf16 %v105_v31, %v104_v29  ;;  %v807_v38 = vpack.c.bf16 %v139_v33, %v138_v32  ;;  %v140_v44 = vld [vmem:[#allocation2 + $0x290] sm:$0xff] }
  0x3e   :  { %766 = vmatpush3.bf16.msra.mxu0 %v765_v10  ;;  %v122_v39 = vld [vmem:[#allocation2 + $0x200] sm:$0xff]  ;;  %v123_v40 = vld [vmem:[#allocation2 + $0x208] sm:$0xff]  ;;  %v839_v42 = vpack.c.bf16 %v171_v35, %v170_v34  ;;  %v141_v45 = vld [vmem:[#allocation2 + $0x298] sm:$0xff] }
  0x3f   :  { %768 = vmatprep.subr.bf16.mxu0 %v767_v14  ;;  %v154_v41 = vld [vmem:[#allocation2 + $0x300] sm:$0xff]  ;;  %v155_v43 = vld [vmem:[#allocation2 + $0x308] sm:$0xff]  ;;  %v172_v46 = vld [vmem:[#allocation2 + $0x390] sm:$0xff]  ;;  %v809_v49 = vpack.c.bf16 %v123_v40, %v122_v39  ;;  %v811_v52 = vpack.c.bf16 %v141_v45, %v140_v44 }
  0x40   :  { %798 = vmatpush3.bf16.msra.mxu1 %v797_v13  ;;  %v173_v47 = vld [vmem:[#allocation2 + $0x398] sm:$0xff]  ;;  %v50_v48 = vld [vmem:[%s1060_s0] sm:$0xff]  ;;  %v52_v50 = vld [vmem:[%s1060_s0 + $0x10] sm:$0xff]  ;;  %v841_v51 = vpack.c.bf16 %v155_v43, %v154_v41 }
  0x41   :  { %800 = vmatprep.subr.bf16.mxu1 %v799_v18  ;;  %v124_v53 = vld [vmem:[#allocation2 + $0x210] sm:$0xff]  ;;  %v125_v54 = vld [vmem:[#allocation2 + $0x218] sm:$0xff]  ;;  %v843_v56 = vpack.c.bf16 %v173_v47, %v172_v46  ;;  %v142_v58 = vld [vmem:[#allocation2 + $0x2a0] sm:$0xff] }
  0x42   :  { %770 = vmatpush3.bf16.msra.mxu0 %v769_v24  ;;  %v156_v55 = vld [vmem:[#allocation2 + $0x310] sm:$0xff]  ;;  %v157_v57 = vld [vmem:[#allocation2 + $0x318] sm:$0xff]  ;;  %v143_v59 = vld [vmem:[#allocation2 + $0x2a8] sm:$0xff]  ;;  %v813_v62 = vpack.c.bf16 %v125_v54, %v124_v53 }
  0x43   :  { %772 = vmatprep.subr.bf16.mxu0 %v771_v26  ;;  %v174_v60 = vld [vmem:[#allocation2 + $0x3a0] sm:$0xff]  ;;  %v175_v61 = vld [vmem:[#allocation2 + $0x3a8] sm:$0xff]  ;;  %v845_v63 = vpack.c.bf16 %v157_v57, %v156_v55  ;;  %v815_v0 = vpack.c.bf16 %v143_v59, %v142_v58  ;;  %v144_v6 = vld [vmem:[#allocation2 + $0x2b0] sm:$0xff] }
  0x44   :  { %802 = vmatpush3.bf16.msra.mxu1 %v801_v25  ;;  %v126_v1 = vld [vmem:[#allocation2 + $0x220] sm:$0xff]  ;;  %v127_v2 = vld [vmem:[#allocation2 + $0x228] sm:$0xff]  ;;  %v847_v4 = vpack.c.bf16 %v175_v61, %v174_v60  ;;  %v145_v7 = vld [vmem:[#allocation2 + $0x2b8] sm:$0xff] }
  0x45   :  { %804 = vmatprep.subr.bf16.mxu1 %v803_v30  ;;  %v158_v3 = vld [vmem:[#allocation2 + $0x320] sm:$0xff]  ;;  %v159_v5 = vld [vmem:[#allocation2 + $0x328] sm:$0xff]  ;;  %v176_v8 = vld [vmem:[#allocation2 + $0x3b0] sm:$0xff]  ;;  %v817_v10 = vpack.c.bf16 %v127_v2, %v126_v1  ;;  %v819_v12 = vpack.c.bf16 %v145_v7, %v144_v6 }
  0x46   :  { %774 = vmatpush3.bf16.msra.mxu0 %v773_v36  ;;  %v177_v9 = vld [vmem:[#allocation2 + $0x3b8] sm:$0xff]  ;;  %v849_v11 = vpack.c.bf16 %v159_v5, %v158_v3  ;;  %v128_v13 = vld [vmem:[#allocation2 + $0x230] sm:$0xff]  ;;  %v146_v18 = vld [vmem:[#allocation2 + $0x2c0] sm:$0xff] }
  0x47   :  { %808 = vmatprep.subr.bf16.mxu0 %v807_v38  ;;  %v129_v14 = vld [vmem:[#allocation2 + $0x238] sm:$0xff]  ;;  %v160_v15 = vld [vmem:[#allocation2 + $0x330] sm:$0xff]  ;;  %v851_v16 = vpack.c.bf16 %v177_v9, %v176_v8  ;;  %v147_v19 = vld [vmem:[#allocation2 + $0x2c8] sm:$0xff] }
  0x48   :  { %806 = vmatpush3.bf16.msra.mxu1 %v805_v37  ;;  %v161_v17 = vld [vmem:[#allocation2 + $0x338] sm:$0xff]  ;;  %v178_v20 = vld [vmem:[#allocation2 + $0x3c0] sm:$0xff]  ;;  %v179_v21 = vld [vmem:[#allocation2 + $0x3c8] sm:$0xff]  ;;  %v821_v22 = vpack.c.bf16 %v129_v14, %v128_v13  ;;  %v823_v26 = vpack.c.bf16 %v147_v19, %v146_v18 }
  0x49   :  { %840 = vmatprep.subr.bf16.mxu1 %v839_v42  ;;  %258 = vmatmul.mubr.f32.vlgmr.msra.gmra.mrb[0].mxu0 %v50_v48  ;;  %v55_v23 = vld [vmem:[%s1060_s0 + $0x28] sm:$0xff]  ;;  %v57_v24 = vld [vmem:[%s1060_s0 + $0x38] sm:$0xff]  ;;  %v853_v25 = vpack.c.bf16 %v161_v17, %v160_v15  ;;  %v130_v27 = vld [vmem:[#allocation2 + $0x240] sm:$0xff]  ;;  %v855_v30 = vpack.c.bf16 %v179_v21, %v178_v20 }
  0x4a   :  { %810 = vmatpush3.bf16.msra.mxu0 %v809_v49  ;;  %v131_v28 = vld [vmem:[#allocation2 + $0x248] sm:$0xff]  ;;  %v162_v29 = vld [vmem:[#allocation2 + $0x340] sm:$0xff]  ;;  %v148_v32 = vld [vmem:[#allocation2 + $0x2d0] sm:$0xff]  ;;  %397 = vmatprep.mubr.f32.mxu0 %v55_v23 }
  0x4b   :  { %328 = vmatmul.mubr.f32.vlgmr.msra.gmra.mrb[0].mxu1 %v52_v50  ;;  %812 = vmatprep.subr.bf16.mxu0 %v811_v52  ;;  %v163_v31 = vld [vmem:[#allocation2 + $0x348] sm:$0xff]  ;;  %v149_v33 = vld [vmem:[#allocation2 + $0x2d8] sm:$0xff]  ;;  %v180_v34 = vld [vmem:[#allocation2 + $0x3d0] sm:$0xff]  ;;  %v825_v36 = vpack.c.bf16 %v131_v28, %v130_v27 }
  0x4c   :  { %842 = vmatpush3.bf16.msra.mxu1 %v841_v51  ;;  %v181_v35 = vld [vmem:[#allocation2 + $0x3d8] sm:$0xff]  ;;  %467 = vmatprep.mubr.f32.mxu1 %v57_v24  ;;  %v857_v37 = vpack.c.bf16 %v163_v31, %v162_v29  ;;  %v827_v38 = vpack.c.bf16 %v149_v33, %v148_v32  ;;  %v132_v39 = vld [vmem:[#allocation2 + $0x250] sm:$0xff]  ;;  %v150_v44 = vld [vmem:[#allocation2 + $0x2e0] sm:$0xff] }
  0x4d   :  { %844 = vmatprep.subr.bf16.mxu1 %v843_v56  ;;  %v133_v40 = vld [vmem:[#allocation2 + $0x258] sm:$0xff]  ;;  %v164_v41 = vld [vmem:[#allocation2 + $0x350] sm:$0xff]  ;;  %v859_v42 = vpack.c.bf16 %v181_v35, %v180_v34  ;;  %v151_v45 = vld [vmem:[#allocation2 + $0x2e8] sm:$0xff] }
  0x4e   :  { %814 = vmatpush3.bf16.msra.mxu0 %v813_v62  ;;  %v165_v43 = vld [vmem:[#allocation2 + $0x358] sm:$0xff]  ;;  %v182_v46 = vld [vmem:[#allocation2 + $0x3e0] sm:$0xff]  ;;  %v183_v47 = vld [vmem:[#allocation2 + $0x3e8] sm:$0xff]  ;;  %v829_v48 = vpack.c.bf16 %v133_v40, %v132_v39  ;;  %v831_v50 = vpack.c.bf16 %v151_v45, %v150_v44 }
  0x4f   :  { %816 = vmatprep.subr.bf16.mxu0 %v815_v0  ;;  %v861_v49 = vpack.c.bf16 %v165_v43, %v164_v41  ;;  %v134_v51 = vld [vmem:[#allocation2 + $0x260] sm:$0xff]  ;;  %v135_v52 = vld [vmem:[#allocation2 + $0x268] sm:$0xff]  ;;  %v863_v54 = vpack.c.bf16 %v183_v47, %v182_v46  ;;  %v152_v56 = vld [vmem:[#allocation2 + $0x2f0] sm:$0xff] }
  0x50   :  { %846 = vmatpush3.bf16.msra.mxu1 %v845_v63  ;;  %v166_v53 = vld [vmem:[#allocation2 + $0x360] sm:$0xff]  ;;  %v167_v55 = vld [vmem:[#allocation2 + $0x368] sm:$0xff]  ;;  %v153_v57 = vld [vmem:[#allocation2 + $0x2f8] sm:$0xff]  ;;  %v833_v60 = vpack.c.bf16 %v135_v52, %v134_v51 }
  0x51   :  { %848 = vmatprep.subr.bf16.mxu1 %v847_v4  ;;  %v184_v58 = vld [vmem:[#allocation2 + $0x3f0] sm:$0xff]  ;;  %v185_v59 = vld [vmem:[#allocation2 + $0x3f8] sm:$0xff]  ;;  %v865_v61 = vpack.c.bf16 %v167_v55, %v166_v53  ;;  %v835_v62 = vpack.c.bf16 %v153_v57, %v152_v56  ;;  %v54_v6 = vld [vmem:[%s1060_s0 + $0x20] sm:$0xff]  ;;  %v964_v56 = vmov 0.0  }
  0x52   :  { %818 = vmatpush3.bf16.msra.mxu0 %v817_v10  ;;  %v136_v63 = vld [vmem:[#allocation2 + $0x270] sm:$0xff]  ;;  %v137_v0 = vld [vmem:[#allocation2 + $0x278] sm:$0xff]  ;;  %v867_v1 = vpack.c.bf16 %v185_v59, %v184_v58  ;;  %v475_v8 = vld [vmem:[#allocation4 + $0x8] sm:$0xff] }
  0x53   :  { %820 = vmatprep.subr.bf16.mxu0 %v819_v12  ;;  %v168_v2 = vld [vmem:[#allocation2 + $0x370] sm:$0xff]  ;;  %v169_v3 = vld [vmem:[#allocation2 + $0x378] sm:$0xff]  ;;  %v837_v4 = vpack.c.bf16 %v137_v0, %v136_v63  ;;  %v474_v10 = vld [vmem:[#allocation4] sm:$0xff] }
  0x54   :  { %850 = vmatpush3.bf16.msra.mxu1 %v849_v11  ;;  %v869_v5 = vpack.c.bf16 %v169_v3, %v168_v2  ;;  %v56_v7 = vld [vmem:[%s1060_s0 + $0x30] sm:$0xff]  ;;  %v477_v9 = vld [vmem:[#allocation4 + $0x18] sm:$0xff]  ;;  %v479_v13 = vld [vmem:[#allocation4 + $0x28] sm:$0xff] }
  0x55   :  { %852 = vmatprep.subr.bf16.mxu1 %v851_v16  ;;  %v871_v11 = vpack.c.bf16 %v477_v9, %v475_v8  ;;  %v476_v12 = vld [vmem:[#allocation4 + $0x10] sm:$0xff]  ;;  %v481_v14 = vld [vmem:[#allocation4 + $0x38] sm:$0xff]  ;;  %v478_v17 = vld [vmem:[#allocation4 + $0x20] sm:$0xff] }
  0x56   :  { %822 = vmatpush3.bf16.msra.mxu0 %v821_v22  ;;  %v873_v15 = vpack.c.bf16 %v476_v12, %v474_v10  ;;  %v875_v16 = vpack.c.bf16 %v481_v14, %v479_v13  ;;  %v480_v18 = vld [vmem:[#allocation4 + $0x30] sm:$0xff]  ;;  %v483_v19 = vld [vmem:[#allocation4 + $0x48] sm:$0xff]  ;;  %v485_v20 = vld [vmem:[#allocation4 + $0x58] sm:$0xff] }
  0x57   :  { %824 = vmatprep.subr.bf16.mxu0 %v823_v26  ;;  %v877_v21 = vpack.c.bf16 %v480_v18, %v478_v17  ;;  %v879_v22 = vpack.c.bf16 %v485_v20, %v483_v19  ;;  %v482_v23 = vld [vmem:[#allocation4 + $0x40] sm:$0xff]  ;;  %v484_v24 = vld [vmem:[#allocation4 + $0x50] sm:$0xff]  ;;  %v489_v26 = vld [vmem:[#allocation4 + $0x78] sm:$0xff] }
  0x58   :  { %854 = vmatpush3.bf16.msra.mxu1 %v853_v25  ;;  %v487_v25 = vld [vmem:[#allocation4 + $0x68] sm:$0xff]  ;;  %v881_v27 = vpack.c.bf16 %v484_v24, %v482_v23  ;;  %v486_v29 = vld [vmem:[#allocation4 + $0x60] sm:$0xff]  ;;  %v493_v32 = vld [vmem:[#allocation4 + $0x98] sm:$0xff] }
  0x59   :  { %856 = vmatprep.subr.bf16.mxu1 %v855_v30  ;;  %v883_v28 = vpack.c.bf16 %v489_v26, %v487_v25  ;;  %v488_v30 = vld [vmem:[#allocation4 + $0x70] sm:$0xff]  ;;  %v491_v31 = vld [vmem:[#allocation4 + $0x88] sm:$0xff]  ;;  %v490_v35 = vld [vmem:[#allocation4 + $0x80] sm:$0xff] }
  0x5a   :  { %826 = vmatpush3.bf16.msra.mxu0 %v825_v36  ;;  %v885_v33 = vpack.c.bf16 %v488_v30, %v486_v29  ;;  %v887_v34 = vpack.c.bf16 %v493_v32, %v491_v31  ;;  %v492_v36 = vld [vmem:[#allocation4 + $0x90] sm:$0xff]  ;;  %v494_v41 = vld [vmem:[#allocation4 + $0xa0] sm:$0xff]  ;;  %v499_v44 = vld [vmem:[#allocation4 + $0xc8] sm:$0xff] }
  0x5b   :  { %828 = vmatprep.subr.bf16.mxu0 %v827_v38  ;;  %v497_v38 = vld [vmem:[#allocation4 + $0xb8] sm:$0xff]  ;;  %v889_v39 = vpack.c.bf16 %v492_v36, %v490_v35  ;;  %v498_v47 = vld [vmem:[#allocation4 + $0xc0] sm:$0xff] }
  0x5c   :  { %858 = vmatpush3.bf16.msra.mxu1 %v857_v37  ;;  %v495_v37 = vld [vmem:[#allocation4 + $0xa8] sm:$0xff]  ;;  %v501_v45 = vld [vmem:[#allocation4 + $0xd8] sm:$0xff]  ;;  %v502_v53 = vld [vmem:[#allocation4 + $0xe0] sm:$0xff] }
  0x5d   :  { %860 = vmatprep.subr.bf16.mxu1 %v859_v42  ;;  %v891_v40 = vpack.c.bf16 %v497_v38, %v495_v37  ;;  %v496_v42 = vld [vmem:[#allocation4 + $0xb0] sm:$0xff]  ;;  %v895_v46 = vpack.c.bf16 %v501_v45, %v499_v44  ;;  %v505_v51 = vld [vmem:[#allocation4 + $0xf8] sm:$0xff]  ;;  %v602_v58 = vld [vmem:[%s1062_s2] ss:$0 sm:$0xff] }
  0x5e   :  { %830 = vmatpush3.bf16.msra.mxu0 %v829_v48  ;;  %v893_v43 = vpack.c.bf16 %v496_v42, %v494_v41  ;;  %v500_v48 = vld [vmem:[#allocation4 + $0xd0] sm:$0xff]  ;;  %v506_v14 = vld [vmem:[%s1064_s4] sm:$0x3] }
  0x5f   :  { %832 = vmatprep.subr.bf16.mxu0 %v831_v50  ;;  %v503_v50 = vld [vmem:[#allocation4 + $0xe8] sm:$0xff] }
  0x60   :  { %862 = vmatpush3.bf16.msra.mxu1 %v861_v49  ;;  %v897_v49 = vpack.c.bf16 %v500_v48, %v498_v47  ;;  %v899_v52 = vpack.c.bf16 %v505_v51, %v503_v50 }
  0x61   :  { %864 = vmatprep.subr.bf16.mxu1 %v863_v54  ;;  %v504_v54 = vld [vmem:[#allocation4 + $0xf0] sm:$0xff] }
  0x62   :  { %834 = vmatpush3.bf16.msra.mxu0 %v833_v60  ;;  %v901_v55 = vpack.c.bf16 %v504_v54, %v502_v53 }
  0x63   :  { %836 = vmatprep.subr.bf16.mxu0 %v835_v62 }
  0x64   :  { %866 = vmatpush3.bf16.msra.mxu1 %v865_v61 }
  0x65   :  { %868 = vmatprep.subr.bf16.mxu1 %v867_v1 }
  0x66   :  { %838 = vmatpush3.bf16.msra.mxu0 %v837_v4 }
  0x67   :  { %872 = vmatprep.subr.bf16.mxu0 %v871_v11  ;;  %v508_v11 = vlaneseq }
  0x68   :  { %870 = vmatpush3.bf16.msra.mxu1 %v869_v5 }
  0x69   :  { %398 = vmatmul.mubr.f32.vlgmr.msra.gmra.mrb[2].mxu0 %v54_v6  ;;  %v509_v12 = vshrl.u32 %v508_v11, 7 }
  0x6a   :  { %874 = vmatpush1.bf16.msra.mxu0 %v873_v15  ;;  %582 = vmatprep.mubr.f32.mxu0 %v964_v56 }
  0x6b   :  { %468 = vmatmul.mubr.f32.vlgmr.msra.gmra.mrb[2].mxu1 %v56_v7  ;;  %876 = vmatprep.subr.bf16.mxu0 %v875_v16  ;;  %v510_v13 = vsub.s32 0, %v509_v12  ;;  %v514_v15 = vsub.s32 1, %v509_v12 }
  0x6d   :  { %v511_v16 = vrot.slane %v506_v14, %v510_v13  ;;  %v515_v17 = vrot.slane %v506_v14, %v514_v15 }
  0x6e   :  { %878 = vmatpush1.bf16.msra.mxu0 %v877_v21 }
  0x6f   :  { %880 = vmatprep.subr.bf16.mxu0 %v879_v22 }
  0x72   :  { %882 = vmatpush1.bf16.msra.mxu0 %v881_v27 }
  0x73   :  { %884 = vmatprep.subr.bf16.mxu0 %v883_v28 }
  0x76   :  { %886 = vmatpush1.bf16.msra.mxu0 %v885_v33 }
  0x77   :  { %888 = vmatprep.subr.bf16.mxu0 %v887_v34 }
  0x7a   :  { %890 = vmatpush1.bf16.msra.mxu0 %v889_v39 }
  0x7b   :  { %892 = vmatprep.subr.bf16.mxu0 %v891_v40 }
  0x7e   :  { %894 = vmatpush1.bf16.msra.mxu0 %v893_v43 }
  0x7f   :  { %896 = vmatprep.subr.bf16.mxu0 %v895_v46 }
  0x82   :  { %898 = vmatpush1.bf16.msra.mxu0 %v897_v49 }
  0x83   :  { %900 = vmatprep.subr.bf16.mxu0 %v899_v52 }
  0x86   :  { %902 = vmatpush1.bf16.msra.mxu0 %v901_v55 }
 0x11c   :  { %v635_v57 = vpop.f32.mrb[0].mxu0 }
 0x11d   :  { %v636_v59 = vpop.f32.mrb[1].mxu0 }
 0x11e   :  { %v670_v60 = vpop.f32.mrb[0].mxu1  ;;  %v637_v61 = vadd.f32 %v636_v59, %v635_v57 }
 0x11f   :  { %v671_v62 = vpop.f32.mrb[1].mxu1 }
 0x120   :  { %v672_v63 = vadd.f32 %v671_v62, %v670_v60  ;;  %v260_v0 = vadd.f32 %v637_v61, %v602_v58 }
 0x122   :  { %v330_v1 = vadd.f32 %v672_v63, %v260_v0 }
 0x13c   :  { %v705_v2 = vpop.f32.mrb[2].mxu0 }
 0x13d   :  { %v706_v3 = vpop.f32.mrb[3].mxu0 }
 0x13e   :  { %v740_v4 = vpop.f32.mrb[2].mxu1  ;;  %v707_v5 = vadd.f32 %v706_v3, %v705_v2 }
 0x13f   :  { %v741_v6 = vpop.f32.mrb[3].mxu1 }
 0x140   :  { %v742_v7 = vadd.f32 %v741_v6, %v740_v4  ;;  %v400_v8 = vadd.f32 %v707_v5, %v330_v1 }
 0x142   :  { %v470_v9 = vadd.f32 %v742_v7, %v400_v8 }
 0x144   :  { %v473_v10 = vmax.f32 %v470_v9, 0.0 }
 0x146   :  { %583 = vmatmul.mubr.f32.vlgmr.msra.gmra.mrb[4].mxu0 %v473_v10 }
 0x219   :  { %v584_v18 = vpop.f32.mrb[4].mxu0 }
 0x21a   :  { %v585_v19 = vadd.f32 %v584_v18, %v511_v16  ;;  %v586_v20 = vpop.f32.mrb[5].mxu0 }
 0x21b   :  { %v587_v21 = vadd.f32 %v586_v20, %v515_v17 }
 0x21c   :  { %589 = vst [vmem:[%s1065_s5] sm:$0xff] %v585_v19 }
 0x21d   :  { %v590_v22 = vmax.f32 %v587_v21, 0.0 }
 0x21f   :  { %591 = vst [vmem:[%s1066_s6] sm:$0xff] %v590_v22 }
 0x220   :  { %600 = vsyncpa [#allocation3], 1 }
 0x221   :  { %601 = vsyncpa [#allocation5], 1 }

</bundles_post_ra>
